<compile_context>
chip_gen: v6e
topology: v6e:2x2x1
jax: 0.10.0
libtpu: 0.0.40
codegen_flags: <defaults>
</compile_context>

<pallas_src>
import jax
import jax.numpy as jnp
from jax.experimental import pallas as pl
from jax.experimental.pallas import tpu as pltpu


def model_kernel(x_ref, wt_ref, b_ref, o_ref):
    # x_ref:  (N, C*H*W) f32  lane-dense flattened input
    # wt_ref: (N, O)     f32  weight.T * (1/(C*H*W))  (mean divisor pre-folded)
    # b_ref:  (1, O)     f32  bias + 11406.122 * weight.sum(axis=1)
    # o_ref:  (1, O)     f32  full forward result
    # Single fused row-sum == mean over W, then C, then H per batch row
    # (the 1/CHW scale lives in wt_ref).
    s = jnp.sum(x_ref[...], axis=-1, keepdims=True)                  # (N, 1)
    # Tiny GEMV on the VPU/XLU: broadcast-mul + sublane reduce (MXU avoided),
    # bias fused into the same store.
    o_ref[...] = jnp.sum(s * wt_ref[...], axis=0, keepdims=True) + b_ref[...]


def model_forward(x, weight, bias):
    """x: (N, C, H, W) f32, weight: (O, N) f32, bias: (O,) f32 -> (O,) f32."""
    N, C, H, W = x.shape
    O = weight.shape[0]
    CHW = C * H * W

    # Contiguous NCHW reshape -> free bitcast, gives a lane-dense 2-D layout.
    x2d = x.reshape(N, CHW)
    # Fold the mean divisor into the weight (trace-time constant folding).
    wt = weight.T * jnp.float32(1.0 / CHW)                           # (N, O)
    # Fold the constant offset (v1 + 11406.122) into the bias:
    #   W @ (v1 + c) + b == W @ v1 + (b + c * W.sum(axis=1))
    b_adj = (bias + jnp.float32(11406.122) * jnp.sum(weight, axis=1)).reshape(1, O)

    # Whole problem fits VMEM: no grid, no pipeline machinery, one launch.
    out = pl.pallas_call(
        model_kernel,
        out_shape=jax.ShapeDtypeStruct((1, O), jnp.float32),
        in_specs=[
            pl.BlockSpec(memory_space=pltpu.MemorySpace.VMEM),
            pl.BlockSpec(memory_space=pltpu.MemorySpace.VMEM),
            pl.BlockSpec(memory_space=pltpu.MemorySpace.VMEM),
        ],
        out_specs=pl.BlockSpec(memory_space=pltpu.MemorySpace.VMEM),
    )(x2d, wt, b_adj)

    return out.reshape(O)


if __name__ == "__main__":
    key = jax.random.PRNGKey(0)
    kx, kw, kb = jax.random.split(key, 3)

    # Small shapes consistent with the module structure (see NOTE above):
    # Linear.in_features == N (leading dim of x1), out_features == 2.
    # C*H*W = 1024 -> lane-dense (multiple of 128).
    N, C, H, W = 8, 4, 16, 16
    IN_F, OUT_F = N, 2

    x = jax.random.normal(kx, (N, C, H, W), dtype=jnp.float32)
    bound = 1.0 / (IN_F ** 0.5)     # PyTorch Linear default init range
    weight = jax.random.uniform(kw, (OUT_F, IN_F), minval=-bound, maxval=bound,
                                dtype=jnp.float32)
    bias = jax.random.uniform(kb, (OUT_F,), minval=-bound, maxval=bound,
                              dtype=jnp.float32)

    fwd = jax.jit(model_forward)
    out = jax.block_until_ready(fwd(x, weight, bias))

    # Plain-JAX reference mirroring the PyTorch forward.
    m1 = jnp.mean(x, axis=-1)
    m2 = jnp.mean(m1, axis=-2)
    v1 = jnp.mean(m2, axis=-1) + 11406.122
    ref = weight @ v1 + bias
    assert out.shape == (OUT_F,)
    assert jnp.allclose(out, ref, rtol=1e-4, atol=1e-2), (out, ref)

    print("KERNEL_OK")
</pallas_src>

<mosaic_0001>
module attributes {stable_mosaic.version = 11 : i64} {
  func.func @model_kernel(%arg0: memref<8x1024xf32, #tpu.memory_space<vmem>>, %arg1: memref<8x2xf32, #tpu.memory_space<vmem>>, %arg2: memref<1x2xf32, #tpu.memory_space<vmem>>, %arg3: memref<1x2xf32, #tpu.memory_space<vmem>>) attributes {dimension_semantics = [], scalar_prefetch = 0 : i64, scratch_operands = 0 : i64, tpu.core_type = #tpu.core_type<tc>} {
    %c0 = arith.constant 0 : index
    %c0_0 = arith.constant 0 : index
    %0 = vector.load %arg0[%c0, %c0_0] : memref<8x1024xf32, #tpu.memory_space<vmem>>, vector<8x1024xf32>
    %cst = arith.constant dense<0.000000e+00> : vector<8xf32>
    %1 = vector.multi_reduction <add>, %0, %cst [1] : vector<8x1024xf32> to vector<8xf32>
    %2 = vector.shape_cast %1 : vector<8xf32> to vector<8x1xf32>
    %c0_1 = arith.constant 0 : index
    %c0_2 = arith.constant 0 : index
    %3 = vector.load %arg1[%c0_1, %c0_2] : memref<8x2xf32, #tpu.memory_space<vmem>>, vector<8x2xf32>
    %4 = vector.broadcast %2 : vector<8x1xf32> to vector<8x2xf32>
    %5 = arith.mulf %4, %3 : vector<8x2xf32>
    %cst_3 = arith.constant dense<0.000000e+00> : vector<2xf32>
    %6 = vector.multi_reduction <add>, %5, %cst_3 [0] : vector<8x2xf32> to vector<2xf32>
    %7 = vector.shape_cast %6 : vector<2xf32> to vector<1x2xf32>
    %c0_4 = arith.constant 0 : index
    %c0_5 = arith.constant 0 : index
    %8 = vector.load %arg2[%c0_4, %c0_5] : memref<1x2xf32, #tpu.memory_space<vmem>>, vector<1x2xf32>
    %9 = arith.addf %7, %8 : vector<1x2xf32>
    %c0_6 = arith.constant 0 : index
    %c0_7 = arith.constant 0 : index
    %10 = vector.load %arg3[%c0_6, %c0_7] : memref<1x2xf32, #tpu.memory_space<vmem>>, vector<1x2xf32>
    tpu.vector_store %arg3[%c0_6, %c0_7], %9 {strides = array<i32>} : memref<1x2xf32, #tpu.memory_space<vmem>>, vector<1x2xf32>,
    return
  }
}

</mosaic_0001>

<bundles_post_ra>
// kernel: model_forward.1
= control target key start
LH: loop header
LB: loop body
LE: loop exit
PB: predicated region body
PF: predicated region fallthrough
CT: control target
= control target key end

     0   :  { %s137_s0 = inlined_call_operand.vmem [shape: f32[8,1024], index: 0, kind: input, shape index: {}]   ;;  %s138_s1 = inlined_call_operand.vmem [shape: f32[8,2], index: 1, kind: input, shape index: {}]   ;;  %s139_s2 = inlined_call_operand.vmem [shape: f32[1,2], index: 2, kind: input, shape index: {}]   ;;  %s140_s3 = inlined_call_operand.hbm [shape: f32[1,2], index: 3, kind: output, shape index: {}]  }
   0x1   :  { %v15_v0 = vld [vmem:[%s137_s0] sm:$0xff]  ;;  %v16_v1 = vld [vmem:[%s137_s0 + $0x8] sm:$0xff]  ;;  %v17_v2 = vld [vmem:[%s137_s0 + $0x10] sm:$0xff] }
   0x2   :  { %v23_v3 = vadd.f32 %v16_v1, %v15_v0  ;;  %v18_v4 = vld [vmem:[%s137_s0 + $0x18] sm:$0xff] }
   0x3   :  { %8 = vsyncpa [#allocation3], 0  ;;  %v19_v6 = vld [vmem:[%s137_s0 + $0x20] sm:$0xff]  ;;  %v20_v8 = vld [vmem:[%s137_s0 + $0x28] sm:$0xff]  ;;  %vm34_vm0 = vcmask 15360   ;;  %vm44_vm1 = vcmask 8192  }
   0x4   :  { %v24_v5 = vadd.f32 %v23_v3, %v17_v2  ;;  %v21_v10 = vld [vmem:[%s137_s0 + $0x30] sm:$0xff]  ;;  %v22_v12 = vld [vmem:[%s137_s0 + $0x38] sm:$0xff]  ;;  %v32_v15 = vld [vmem:[%s138_s1] sm:$0xff]  ;;  %s83_s0 = smov [#allocation2]  }
   0x5   :  { %v42_v24 = vld [vmem:[%s139_s2] sm:$0x1]  ;;  %s52_s5 = sshll.u32 %s83_s0, 4  ;;  %s53_s5 = int_to_ptr.vmem [resolvable:$true] %s52_s5 }
   0x6   :  { %v25_v7 = vadd.f32 %v24_v5, %v18_v4  ;;  %s61_s1 = scalar_lea.vmem %s53_s5, 16  ;;  %s65_s6 = scalar_lea.vmem %s53_s5, 32 }
   0x7   :  { %p62_p0 = scmp.ne.s32.totalorder %s53_s5, %s61_s1  ;;  %p66_p1 = scmp.lt.s32.totalorder %s53_s5, %s53_s5 }
   0x8   :  { %v26_v9 = vadd.f32 %v25_v7, %v19_v6  ;;  %p67_p2 = scmp.lt.s32.totalorder %s65_s6, %s61_s1 }
   0xa   :  { %v27_v11 = vadd.f32 %v26_v9, %v20_v8  ;;  %p68_p3 = por %p67_p2, %p66_p1 }
   0xc   :  { %v28_v13 = vadd.f32 %v27_v11, %v21_v10  ;;  %p69_p4 = pnand %p68_p3, %p62_p0 }
   0xe   :  { %v29_v14 = vadd.f32 %v28_v13, %v22_v12 }
  0x10   :  { %30 = vadd.xlane.f32.xlu0 %v29_v14 }
  0x99   :  { %v31_v16 = vpop.xlane.xlu0 %30 }
  0x9a   :  { %v33_v17 = vmul.f32 %v32_v15, %v31_v16 }
  0x9c   :  { %v35_v18 = vsel %vm34_vm0, %v33_v17, 0.0 }
  0x9d   :  { %v36_v19 = vrot.slane %v35_v18, 4 }
  0x9f   :  { %v37_v20 = vadd.f32 %v36_v19, %v35_v18 }
  0xa1   :  { %v38_v21 = vrot.slane %v37_v20, 2 }
  0xa3   :  { %v39_v22 = vadd.f32 %v38_v21, %v37_v20 }
  0xa5   :  { %v40_v23 = vrot.slane %v39_v22, 1 }
  0xa7   :  { %v41_v25 = vadd.f32 %v40_v23, %v39_v22 }
  0xa9   :  { %v43_v26 = vadd.f32 %v42_v24, %v41_v25 }
  0xab   :  { %45 = vst.msk [vmem:[#allocation2] sm:$0x1] %vm44_vm1, %v43_v26 }
  0xac   :  { %72 = shalt.err (!%p69_p4)
}
  0xad   :  { %55 = dma.vmem_to_hbm [thread:$0]  %s53_s5, 16, %s140_s3, [#allocation3]  }
  0xae   :  { %81 = dma.done.wait [#allocation3], 16  }
  0xaf   :  { %82 = vsyncadd [#allocation3], 4294967280 }
  0xb0   :  { %59 = vsyncpa [#allocation3], 1 }

</bundles_post_ra>
